<compile_context>
chip_gen: v5e
topology: v5e:2x2
jax: 0.10.0
libtpu: 0.0.40
codegen_flags: <defaults>
</compile_context>

<pallas_src>
import functools

import jax
import jax.numpy as jnp
from jax import lax
from jax.experimental import pallas as pl
from jax.experimental.pallas import tpu as pltpu


def _round_up(x, m):
    return (x + m - 1) // m * m


# ----------------------------- kernel 1: tiled MLP ----------------------------------
def mlp_kernel(xT_ref,
               w1_ref, b1_ref,
               w2_ref, b2_ref,
               w3_ref, b3_ref,
               w4_ref, b4_ref,
               logits_ref):
    """One batch tile: activations are (features, batch_tile); batch on lanes."""
    x = xT_ref[...]                                   # (dim_in, TB), compute dtype
    w1, w2, w3, w4 = w1_ref[...], w2_ref[...], w3_ref[...], w4_ref[...]
    b1, b2, b3, b4 = b1_ref[...], b2_ref[...], b3_ref[...], b4_ref[...]  # (out, 1) f32
    cdt = w1.dtype                                    # bf16 (MXU) or f32

    h = jnp.dot(w1, x, preferred_element_type=jnp.float32) + b1           # (64, TB) f32
    h = jnp.maximum(h, 0.0).astype(cdt)
    h = jnp.dot(w2, h, preferred_element_type=jnp.float32) + b2           # (32, TB)
    h = jnp.maximum(h, 0.0).astype(cdt)
    h = jnp.dot(w3, h, preferred_element_type=jnp.float32) + b3           # (32, TB)
    h = jnp.maximum(h, 0.0).astype(cdt)
    logits = jnp.dot(w4, h, preferred_element_type=jnp.float32) + b4      # (dim_out, TB)
    logits_ref[...] = logits.astype(logits_ref.dtype)


# -------------------- kernel 2: softmax over the batch axis (dim=0) -----------------
def softmax_batch_kernel(logits_ref, out_ref, *, valid_cols):
    """Softmax over the batch axis (= lane axis here), masking padded batch columns."""
    logits = logits_ref[...]                          # (dim_out, padded_batch) f32
    padded = logits.shape[-1]
    if valid_cols < padded:                           # static (trace-time) branch
        col = lax.broadcasted_iota(jnp.int32, logits.shape, dimension=1)
        logits = jnp.where(col < valid_cols, logits, jnp.float32(-1e30))
    m = jnp.max(logits, axis=-1, keepdims=True)
    e = jnp.exp(logits - m)
    denom = jnp.sum(e, axis=-1, keepdims=True)
    # exp and approx reciprocal both hit the (otherwise idle) EUP slot.
    out_ref[...] = (e * pl.reciprocal(denom, approx=True)).astype(out_ref.dtype)


# ----------------------------------- wrapper -----------------------------------------
def neural_network_forward(x, params, *, tile_batch=256, use_bf16=True):
    """x: (batch, dim_in) f32.  params: ((w1,b1),...,(w4,b4)), w_i (out,in), b_i (out,).

    Returns softmax(MLP(x), dim=0) with shape (batch, dim_out), matching the PyTorch
    module's forward pass.
    """
    batch, dim_in = x.shape
    (w1, b1), (w2, b2), (w3, b3), (w4, b4) = params
    dim_out = w4.shape[0]

    compute_dtype = jnp.bfloat16 if use_bf16 else jnp.float32

    # Batch tile: multiple of 128 (MXU / lane width); pad batch up to a tile multiple.
    tb = min(tile_batch, _round_up(batch, 128))
    padded = _round_up(batch, tb)
    num_tiles = padded // tb

    xT = jnp.transpose(x)                             # (dim_in, batch) — batch on lanes
    if padded != batch:
        xT = jnp.pad(xT, ((0, 0), (0, padded - batch)))
    xT = xT.astype(compute_dtype)

    ws = [w.astype(compute_dtype) for w in (w1, w2, w3, w4)]          # (out, in)
    bs = [b.reshape(-1, 1).astype(jnp.float32) for b in (b1, b2, b3, b4)]  # (out, 1) f32

    const_map = lambda i: (0, 0)                      # weights/biases stay resident
    param_specs = []
    for w, b in zip(ws, bs):
        param_specs.append(pl.BlockSpec(w.shape, const_map))
        param_specs.append(pl.BlockSpec(b.shape, const_map))

    flops = 2 * padded * (dim_in * 64 + 64 * 32 + 32 * 32 + 32 * dim_out)
    bytes_in = (xT.size * xT.dtype.itemsize
                + sum(a.size * a.dtype.itemsize for a in ws + bs))
    bytes_out = dim_out * padded * 4

    logits = pl.pallas_call(
        mlp_kernel,
        out_shape=jax.ShapeDtypeStruct((dim_out, padded), jnp.float32),
        grid=(num_tiles,),
        in_specs=[pl.BlockSpec((dim_in, tb), lambda i: (0, i))] + param_specs,
        out_specs=pl.BlockSpec((dim_out, tb), lambda i: (0, i)),
        compiler_params=pltpu.CompilerParams(dimension_semantics=("parallel",)),
        cost_estimate=pl.CostEstimate(flops=flops, transcendentals=0,
                                      bytes_accessed=bytes_in + bytes_out),
    )(xT, ws[0], bs[0], ws[1], bs[1], ws[2], bs[2], ws[3], bs[3])

    # Second pass: softmax over dim=0 (batch) — a cross-tile reduction, so it is done
    # on the full (dim_out, padded_batch) logits slab (tiny: dim_out is 16-64).
    probs_T = pl.pallas_call(
        functools.partial(softmax_batch_kernel, valid_cols=batch),
        out_shape=jax.ShapeDtypeStruct((dim_out, padded), jnp.float32),
        in_specs=[pl.BlockSpec(memory_space=pltpu.MemorySpace.VMEM)],
        out_specs=pl.BlockSpec(memory_space=pltpu.MemorySpace.VMEM),
        cost_estimate=pl.CostEstimate(flops=4 * dim_out * padded,
                                      transcendentals=dim_out * padded,
                                      bytes_accessed=2 * dim_out * padded * 4),
    )(logits)

    return jnp.transpose(probs_T)[:batch]             # (batch, dim_out)


# ----------------------------- init + pure-JAX reference -----------------------------
def init_params(key, dim_in, dim_out):
    """PyTorch nn.Linear-style init: W (out,in), b (out,), uniform ±1/sqrt(fan_in)."""
    dims = [(dim_in, 64), (64, 32), (32, 32), (32, dim_out)]
    params = []
    for i, (fi, fo) in enumerate(dims):
        kw, kb = jax.random.split(jax.random.fold_in(key, i))
        bound = float(fi) ** -0.5
        w = jax.random.uniform(kw, (fo, fi), jnp.float32, -bound, bound)
        b = jax.random.uniform(kb, (fo,), jnp.float32, -bound, bound)
        params.append((w, b))
    return tuple(params)


def reference_forward(x, params, *, use_bf16=True):
    """Pure-JAX reference with the same operand precision as the kernel."""
    cdt = jnp.bfloat16 if use_bf16 else jnp.float32
    (w1, b1), (w2, b2), (w3, b3), (w4, b4) = params
    h = x.astype(cdt)
    for w, b in ((w1, b1), (w2, b2), (w3, b3)):
        h = jnp.dot(h, w.T.astype(cdt), preferred_element_type=jnp.float32) + b[None, :]
        h = jnp.maximum(h, 0.0).astype(cdt)
    logits = jnp.dot(h, w4.T.astype(cdt), preferred_element_type=jnp.float32) + b4[None, :]
    return jax.nn.softmax(logits, axis=0)


if __name__ == "__main__":
    # batch=500: exercises batch tiling (two 256-wide tiles) AND padding/masking of the
    # softmax over dim=0.  dim_in/dim_out small, consistent with the module.
    batch, dim_in, dim_out = 500, 32, 16
    key = jax.random.PRNGKey(0)
    kx, kp = jax.random.split(key)
    x = jax.random.normal(kx, (batch, dim_in), jnp.float32)
    params = init_params(kp, dim_in, dim_out)

    out = neural_network_forward(x, params, tile_batch=256, use_bf16=True)
    jax.block_until_ready(out)

    ref = reference_forward(x, params, use_bf16=True)
    assert out.shape == (batch, dim_out)
    assert bool(jnp.all(jnp.isfinite(out)))
    # Matched-precision reference; tolerance covers MXU accumulation order and the
    # approximate (EUP) reciprocal used in the softmax epilogue.
    assert jnp.allclose(out, ref, atol=1e-4, rtol=1e-2), "mismatch vs reference"
    # softmax over dim=0 -> every output column sums to 1 (also validates the padding mask)
    assert jnp.allclose(jnp.sum(out, axis=0), jnp.ones((dim_out,)), atol=1e-2)

    print("KERNEL_OK")
</pallas_src>

<mosaic_0001>
module attributes {stable_mosaic.version = 11 : i64} {
  func.func @mlp_kernel(%arg0: i32, %arg1: memref<32x256xbf16, #tpu.memory_space<vmem>>, %arg2: memref<64x32xbf16, #tpu.memory_space<vmem>>, %arg3: memref<64x1xf32, #tpu.memory_space<vmem>>, %arg4: memref<32x64xbf16, #tpu.memory_space<vmem>>, %arg5: memref<32x1xf32, #tpu.memory_space<vmem>>, %arg6: memref<32x32xbf16, #tpu.memory_space<vmem>>, %arg7: memref<32x1xf32, #tpu.memory_space<vmem>>, %arg8: memref<16x32xbf16, #tpu.memory_space<vmem>>, %arg9: memref<16x1xf32, #tpu.memory_space<vmem>>, %arg10: memref<16x256xf32, #tpu.memory_space<vmem>>) attributes {dimension_semantics = [#tpu.dimension_semantics<parallel>], iteration_bounds = array<i64: 2>, scalar_prefetch = 0 : i64, scratch_operands = 0 : i64, tpu.core_type = #tpu.core_type<tc>, window_params = [{transform_indices = @transform_0, window_bounds = array<i64: 32, 256>}, {pipeline_mode = #tpu.pipeline_mode<synchronous>, transform_indices = @transform_1, window_bounds = array<i64: 64, 32>}, {pipeline_mode = #tpu.pipeline_mode<synchronous>, transform_indices = @transform_2, window_bounds = array<i64: 64, 1>}, {pipeline_mode = #tpu.pipeline_mode<synchronous>, transform_indices = @transform_3, window_bounds = array<i64: 32, 64>}, {pipeline_mode = #tpu.pipeline_mode<synchronous>, transform_indices = @transform_4, window_bounds = array<i64: 32, 1>}, {pipeline_mode = #tpu.pipeline_mode<synchronous>, transform_indices = @transform_5, window_bounds = array<i64: 32, 32>}, {pipeline_mode = #tpu.pipeline_mode<synchronous>, transform_indices = @transform_6, window_bounds = array<i64: 32, 1>}, {pipeline_mode = #tpu.pipeline_mode<synchronous>, transform_indices = @transform_7, window_bounds = array<i64: 16, 32>}, {pipeline_mode = #tpu.pipeline_mode<synchronous>, transform_indices = @transform_8, window_bounds = array<i64: 16, 1>}, {transform_indices = @transform_9, window_bounds = array<i64: 16, 256>}]} {
    %c0 = arith.constant 0 : index
    %c0_0 = arith.constant 0 : index
    %0 = vector.load %arg1[%c0, %c0_0] : memref<32x256xbf16, #tpu.memory_space<vmem>>, vector<32x256xbf16>
    %c0_1 = arith.constant 0 : index
    %c0_2 = arith.constant 0 : index
    %1 = vector.load %arg2[%c0_1, %c0_2] : memref<64x32xbf16, #tpu.memory_space<vmem>>, vector<64x32xbf16>
    %c0_3 = arith.constant 0 : index
    %c0_4 = arith.constant 0 : index
    %2 = vector.load %arg4[%c0_3, %c0_4] : memref<32x64xbf16, #tpu.memory_space<vmem>>, vector<32x64xbf16>
    %c0_5 = arith.constant 0 : index
    %c0_6 = arith.constant 0 : index
    %3 = vector.load %arg6[%c0_5, %c0_6] : memref<32x32xbf16, #tpu.memory_space<vmem>>, vector<32x32xbf16>
    %c0_7 = arith.constant 0 : index
    %c0_8 = arith.constant 0 : index
    %4 = vector.load %arg8[%c0_7, %c0_8] : memref<16x32xbf16, #tpu.memory_space<vmem>>, vector<16x32xbf16>
    %c0_9 = arith.constant 0 : index
    %c0_10 = arith.constant 0 : index
    %5 = vector.load %arg3[%c0_9, %c0_10] : memref<64x1xf32, #tpu.memory_space<vmem>>, vector<64x1xf32>
    %c0_11 = arith.constant 0 : index
    %c0_12 = arith.constant 0 : index
    %6 = vector.load %arg5[%c0_11, %c0_12] : memref<32x1xf32, #tpu.memory_space<vmem>>, vector<32x1xf32>
    %c0_13 = arith.constant 0 : index
    %c0_14 = arith.constant 0 : index
    %7 = vector.load %arg7[%c0_13, %c0_14] : memref<32x1xf32, #tpu.memory_space<vmem>>, vector<32x1xf32>
    %c0_15 = arith.constant 0 : index
    %c0_16 = arith.constant 0 : index
    %8 = vector.load %arg9[%c0_15, %c0_16] : memref<16x1xf32, #tpu.memory_space<vmem>>, vector<16x1xf32>
    %cst = arith.constant dense<0.000000e+00> : vector<64x256xf32>
    %9 = tpu.matmul %1, %0, %cst {dimension_numbers = #tpu.dot_dimension_numbers<[1], [0], [0], [1], [0, 0, 1, 1], [], []>} : vector<64x32xbf16>, vector<32x256xbf16>, vector<64x256xf32> -> vector<64x256xf32>
    %10 = vector.broadcast %5 : vector<64x1xf32> to vector<64x256xf32>
    %11 = arith.addf %9, %10 : vector<64x256xf32>
    %cst_17 = arith.constant 0.000000e+00 : f32
    %12 = vector.broadcast %cst_17 : f32 to vector<64x256xf32>
    %13 = arith.maximumf %11, %12 : vector<64x256xf32>
    %14 = arith.truncf %13 : vector<64x256xf32> to vector<64x256xbf16>
    %cst_18 = arith.constant dense<0.000000e+00> : vector<32x256xf32>
    %15 = tpu.matmul %2, %14, %cst_18 {dimension_numbers = #tpu.dot_dimension_numbers<[1], [0], [0], [1], [0, 0, 1, 1], [], []>} : vector<32x64xbf16>, vector<64x256xbf16>, vector<32x256xf32> -> vector<32x256xf32>
    %16 = vector.broadcast %6 : vector<32x1xf32> to vector<32x256xf32>
    %17 = arith.addf %15, %16 : vector<32x256xf32>
    %cst_19 = arith.constant 0.000000e+00 : f32
    %18 = vector.broadcast %cst_19 : f32 to vector<32x256xf32>
    %19 = arith.maximumf %17, %18 : vector<32x256xf32>
    %20 = arith.truncf %19 : vector<32x256xf32> to vector<32x256xbf16>
    %cst_20 = arith.constant dense<0.000000e+00> : vector<32x256xf32>
    %21 = tpu.matmul %3, %20, %cst_20 {dimension_numbers = #tpu.dot_dimension_numbers<[1], [0], [0], [1], [0, 0, 1, 1], [], []>} : vector<32x32xbf16>, vector<32x256xbf16>, vector<32x256xf32> -> vector<32x256xf32>
    %22 = vector.broadcast %7 : vector<32x1xf32> to vector<32x256xf32>
    %23 = arith.addf %21, %22 : vector<32x256xf32>
    %cst_21 = arith.constant 0.000000e+00 : f32
    %24 = vector.broadcast %cst_21 : f32 to vector<32x256xf32>
    %25 = arith.maximumf %23, %24 : vector<32x256xf32>
    %26 = arith.truncf %25 : vector<32x256xf32> to vector<32x256xbf16>
    %cst_22 = arith.constant dense<0.000000e+00> : vector<16x256xf32>
    %27 = tpu.matmul %4, %26, %cst_22 {dimension_numbers = #tpu.dot_dimension_numbers<[1], [0], [0], [1], [0, 0, 1, 1], [], []>} : vector<16x32xbf16>, vector<32x256xbf16>, vector<16x256xf32> -> vector<16x256xf32>
    %28 = vector.broadcast %8 : vector<16x1xf32> to vector<16x256xf32>
    %29 = arith.addf %27, %28 : vector<16x256xf32>
    %c0_23 = arith.constant 0 : index
    %c0_24 = arith.constant 0 : index
    %30 = vector.load %arg10[%c0_23, %c0_24] : memref<16x256xf32, #tpu.memory_space<vmem>>, vector<16x256xf32>
    tpu.vector_store %arg10[%c0_23, %c0_24], %29 {strides = array<i32>} : memref<16x256xf32, #tpu.memory_space<vmem>>, vector<16x256xf32>,
    return
  }
  func.func @transform_0(%arg0: i32) -> (i32, i32) {
    %c0_i32 = arith.constant 0 : i32
    %c0_i32_0 = arith.constant 0 : i32
    return %c0_i32, %arg0 : i32, i32
  }
  func.func @transform_1(%arg0: i32) -> (i32, i32) {
    %c0_i32 = arith.constant 0 : i32
    %c0_i32_0 = arith.constant 0 : i32
    %c0_i32_1 = arith.constant 0 : i32
    return %c0_i32, %c0_i32_0 : i32, i32
  }
  func.func @transform_2(%arg0: i32) -> (i32, i32) {
    %c0_i32 = arith.constant 0 : i32
    %c0_i32_0 = arith.constant 0 : i32
    %c0_i32_1 = arith.constant 0 : i32
    return %c0_i32, %c0_i32_0 : i32, i32
  }
  func.func @transform_3(%arg0: i32) -> (i32, i32) {
    %c0_i32 = arith.constant 0 : i32
    %c0_i32_0 = arith.constant 0 : i32
    %c0_i32_1 = arith.constant 0 : i32
    return %c0_i32, %c0_i32_0 : i32, i32
  }
  func.func @transform_4(%arg0: i32) -> (i32, i32) {
    %c0_i32 = arith.constant 0 : i32
    %c0_i32_0 = arith.constant 0 : i32
    %c0_i32_1 = arith.constant 0 : i32
    return %c0_i32, %c0_i32_0 : i32, i32
  }
  func.func @transform_5(%arg0: i32) -> (i32, i32) {
    %c0_i32 = arith.constant 0 : i32
    %c0_i32_0 = arith.constant 0 : i32
    %c0_i32_1 = arith.constant 0 : i32
    return %c0_i32, %c0_i32_0 : i32, i32
  }
  func.func @transform_6(%arg0: i32) -> (i32, i32) {
    %c0_i32 = arith.constant 0 : i32
    %c0_i32_0 = arith.constant 0 : i32
    %c0_i32_1 = arith.constant 0 : i32
    return %c0_i32, %c0_i32_0 : i32, i32
  }
  func.func @transform_7(%arg0: i32) -> (i32, i32) {
    %c0_i32 = arith.constant 0 : i32
    %c0_i32_0 = arith.constant 0 : i32
    %c0_i32_1 = arith.constant 0 : i32
    return %c0_i32, %c0_i32_0 : i32, i32
  }
  func.func @transform_8(%arg0: i32) -> (i32, i32) {
    %c0_i32 = arith.constant 0 : i32
    %c0_i32_0 = arith.constant 0 : i32
    %c0_i32_1 = arith.constant 0 : i32
    return %c0_i32, %c0_i32_0 : i32, i32
  }
  func.func @transform_9(%arg0: i32) -> (i32, i32) {
    %c0_i32 = arith.constant 0 : i32
    %c0_i32_0 = arith.constant 0 : i32
    return %c0_i32, %arg0 : i32, i32
  }
}

</mosaic_0001>

<bundles_post_ra>
// kernel: tpu_custom_call.1
= control target key start
LH: loop header
LB: loop body
LE: loop exit
PB: predicated region body
PF: predicated region fallthrough
CT: control target
= control target key end

     0   :  { %14 = vsyncpa [#allocation4], 0  ;;  %s1363_s0 = inlined_call_operand.vmem [shape: bf16[32,512], index: 0, kind: input, shape index: {}]   ;;  %s1364_s1 = inlined_call_operand.vmem [shape: bf16[64,32], index: 1, kind: input, shape index: {}]   ;;  %s1365_s2 = inlined_call_operand.vmem [shape: f32[64,1], index: 2, kind: input, shape index: {}]   ;;  %s1366_s3 = inlined_call_operand.vmem [shape: bf16[32,64], index: 3, kind: input, shape index: {}]   ;;  %s1367_s4 = inlined_call_operand.vmem [shape: f32[32,1], index: 4, kind: input, shape index: {}]   ;;  %s1368_s5 = inlined_call_operand.vmem [shape: bf16[32,32], index: 5, kind: input, shape index: {}]   ;;  %s1369_s6 = inlined_call_operand.vmem [shape: f32[32,1], index: 6, kind: input, shape index: {}]   ;;  %s1370_s7 = inlined_call_operand.vmem [shape: bf16[16,32], index: 7, kind: input, shape index: {}]   ;;  %s1371_s8 = inlined_call_operand.vmem [shape: f32[16,1], index: 8, kind: input, shape index: {}]   ;;  %s1372_s9 = inlined_call_operand.hbm [shape: f32[16,512], index: 9, kind: output, shape index: {}]  }
   0x1   :  { %16 = vsyncpa [#allocation4 + $0x1], 0  ;;  %s1167_s30 = smov 0   ;;  %s1169_s10 = smov 0  }
   0x2   :  { %s1171_s11 = smov 0   ;;  %s1173_s12 = smov 0  }
   0x3 LB: > { %s903_s13 = sadd.s32 4294967295, %s1111_s12   ;;  %s904_s14 = sadd.s32 4294967294, %s1111_s12   ;;  %s1111_s12 = sphi %s1173_s12, %s1378_s12   ;;  %s1107_s11 = sphi %s1171_s11, %s1377_s11   ;;  %s1103_s10 = sphi %s1169_s10, %s1376_s10   ;;  %s1099_s30 = sphi %s1167_s30, %s1375_s30  }
   0x4   : > { %s1190_s15 = sadd.s32 1, %s1111_s12   ;;  %s29_s16 = sadd.s32 1, %s1107_s11 }
   0x5   : > { %s26_s17 = ssub.s32 %s1111_s12, %s1190_s15  ;;  %p36_p0 = scmp.ne.s32.totalorder %s1107_s11, %s1103_s10 }
   0x6   : > { %p27_p1 = scmp.eq.s32.totalorder %s26_s17, 0  ;;  %p37_p2 = scmp.eq.s32.totalorder %s1111_s12, 0 }
   0x7   : > { %p234_p3 = scmp.eq.s32.totalorder %s903_s13, 1  ;;  %p239_p4 = scmp.ne.s32.totalorder %s1103_s10, %s1099_s30 }
   0x8   : > { %s1203_s18 = scalar_select %p27_p1, %s1107_s11, %s29_s16  }
   0x9   : > { %p38_p5 = por %p37_p2, %p36_p0  ;;  %p1205_p6 = por %p234_p3, %p36_p0 }
   0xa   : > { %p240_p7 = scmp.eq.s32.totalorder %s904_s14, 1  ;;  %p906_p9 = scmp.ge.s32.totalorder %s1111_s12, 2 }
   0xc   : > { %p1209_p8 = por %p240_p7, %p239_p4  ;;  %280 = sbr.rel (%p906_p9) target bundleno = 25 (0x19), region = 48 }
  0x11   : > { %283 = sbr.rel (!%p38_p5) target bundleno = 25 (0x19), region = 52  ;;  %s285_s21 = sand.u32 (%p38_p5), 1, %s1107_s11  }
  0x12   : > { %s988_s22 = sshll.u32 (%p38_p5), %s1111_s12, 3  ;;  %s907_s23 = sshll.u32 (%p38_p5), %s285_s21, 5 }
  0x13   : > { %s290_s26 = scalar_lea.vmem (%p38_p5), %s1363_s0, %s988_s22  ;;  %s287_s27 = scalar_lea.vmem (%p38_p5), [#allocation2], %s907_s23 }
  0x14   : > { %v325_v0 = vld [vmem:[%s290_s26] sm:$0xff] (%p38_p5)  ;;  %v327_v1 = vld [vmem:[%s290_s26 + $0x10] sm:$0xff] (%p38_p5) }
  0x15   : > { %v329_v2 = vld [vmem:[%s290_s26 + $0x20] sm:$0xff] (%p38_p5)  ;;  %326 = vst [vmem:[%s287_s27] sm:$0xff] (%p38_p5), %v325_v0  ;;  %v331_v3 = vld [vmem:[%s290_s26 + $0x30] sm:$0xff] (%p38_p5) }
  0x16   : > { %328 = vst [vmem:[%s287_s27 + $0x8] sm:$0xff] %v327_v1 }
  0x17   : > { %330 = vst [vmem:[%s287_s27 + $0x10] sm:$0xff] %v329_v2 }
  0x18   : > { %332 = vst [vmem:[%s287_s27 + $0x18] sm:$0xff] %v331_v3 }
  0x19 PF: > { %p910_p10 = scmp.ge.s32.totalorder %s1111_s12, 1  ;;  %p337_p11 = scmp.lt.s32.totalorder %s1111_s12, 3 }
  0x1b   : > { %p338_p12 = pnand %p910_p10, %p337_p11 }
  0x1c   : > { %s344_s28 = sand.u32 (!%p338_p12), 1, %s1103_s10   ;;  %s1002_s23 = sshll.u32 (!%p338_p12), %s903_s13, 4 }
  0x1d   : > { %341 = sbr.rel (%p338_p12) target bundleno = 728 (0x2d8), region = 90  ;;  %s1229_s16 = sshll.u32 (!%p338_p12), %s344_s28, 5 }
  0x1e   : > { %s346_s22 = scalar_lea.vmem (!%p338_p12), [#allocation2], %s1229_s16  ;;  %s378_s24 = scalar_lea.vmem (!%p338_p12), [#allocation3], %s1229_s16 }
  0x1f   : > { %s832_s27 = scalar_lea.hbm (!%p338_p12), %s1372_s9, %s1002_s23  ;;  %s833_s29 = sshll.u32 (!%p338_p12), %s378_s24, 4  ;;  %s834_s29 = int_to_ptr.vmem [resolvable:$true] %s833_s29 }
  0x20   : > { %s1330_s14 = sshll.u32 (!%p338_p12), %s832_s27, 4  ;;  %s821_s13 = scalar_lea.sflag (!%p338_p12), [#allocation4], %s344_s28  ;;  %s836_s14 = int_to_ptr.hbm [resolvable:$true] %s1330_s14 }
  0x21   : > { %s1063_s16 = sshra.s32 (!%p338_p12), %s836_s14, 4  ;;  %s1069_s23 = scalar_lea.hbm (!%p338_p12), %s1372_s9, 64  ;;  %s1064_s16 = int_to_ptr.hbm [resolvable:$true] %s1063_s16 }
  0x22   : > { %v410_v4 = vld [vmem:[%s1365_s2 + $0x30] sm:$0xff]  ;;  %v1113_v5 = vmov 0   ;;  %v408_v6 = vld [vmem:[%s1365_s2 + $0x20] sm:$0xff]  ;;  %v992_v8 = vld [vmem:[%s346_s22 + $0x14] sm:$0xf0]  ;;  %vm502_vm0 = vcmask 261120   ;;  %p1070_p2 = scmp.lt.s32.totalorder %s1064_s16, %s1372_s9 }
  0x23   : > { %1046 = vset.pattern.permute.xlu0 %v1113_v5  ;;  %1047 = vset.pattern.permute.xlu1 %v1113_v5  ;;  %v939_v7 = vld [vmem:[%s346_s22 + $0x10] sm:$0xf]  ;;  %v991_v9 = vld [vmem:[%s346_s22 + $0x14] sm:$0xf]  ;;  %v941_v11 = vld [vmem:[%s346_s22 + $0x18] sm:$0xf0] }
  0x24   : > { %454 = vperm.xlu0 %1046, %v410_v4   ;;  %444 = vperm.xlu1 %1047, %v408_v6   ;;  %v940_v10 = vor.u32 %v992_v8, %v939_v7  ;;  %v931_v12 = vld [vmem:[%s346_s22] sm:$0xf]  ;;  %v990_v13 = vld [vmem:[%s346_s22 + $0x4] sm:$0xf0]  ;;  %v944_v14 = vor.u32 %v991_v9, %v941_v11  ;;  %v989_v15 = vld [vmem:[%s346_s22 + $0x4] sm:$0xf] }
  0x25   : > { %1048 = vset.pattern.permute.xlu2 %v1113_v5  ;;  %v933_v16 = vld [vmem:[%s346_s22 + $0x8] sm:$0xf0]  ;;  %v932_v17 = vor.u32 %v990_v13, %v931_v12  ;;  %v411_v19 = vld [vmem:[%s1365_s2 + $0x38] sm:$0xff]  ;;  %v993_v21 = vld [vmem:[%s1364_s1] sm:$0xff]  ;;  %vm627_vm1 = vcmask 523264   ;;  %s1065_s17 = scalar_lea.hbm %s1064_s16, 32 }
  0x26   : > { %521 = vmatpush.bf16.msra.mxu0 %v940_v10  ;;  %550 = vmatpush.bf16.msra.mxu1 %v944_v14  ;;  %v936_v18 = vor.u32 %v989_v15, %v933_v16  ;;  %v409_v20 = vld [vmem:[%s1365_s2 + $0x28] sm:$0xff]  ;;  %v404_v22 = vld [vmem:[%s1365_s2] sm:$0xff]  ;;  %v415_v24 = vld [vmem:[%s1367_s4 + $0x18] sm:$0xff]  ;;  %p1066_p13 = scmp.ne.s32.totalorder %s1064_s16, %s1065_s17  ;;  %p1071_p3 = scmp.lt.s32.totalorder %s1069_s23, %s1065_s17 }
  0x27   : > { %v405_v23 = vld [vmem:[%s1365_s2 + $0x8] sm:$0xff]  ;;  %v412_v25 = vld [vmem:[%s1367_s4] sm:$0xff]  ;;  %v406_v27 = vld [vmem:[%s1365_s2 + $0x10] sm:$0xff] }
  0x28   : > { %v994_v26 = vld [vmem:[%s1364_s1 + $0x8] sm:$0xff]  ;;  %434 = vperm.xlu2 %1048, %v406_v27   ;;  %v418_v28 = vld [vmem:[%s1369_s6 + $0x10] sm:$0xff]  ;;  %v419_v29 = vld [vmem:[%s1369_s6 + $0x18] sm:$0xff]  ;;  %p1067_p0 = pnand %p1066_p13, %p1205_p6  ;;  %p1072_p4 = por %p1071_p3, %p1070_p2 }
  0x29   : > { %v407_v30 = vld [vmem:[%s1365_s2 + $0x18] sm:$0xff]  ;;  %v417_v31 = vld [vmem:[%s1369_s6 + $0x8] sm:$0xff]  ;;  %v420_v32 = vld [vmem:[%s1371_s8] sm:$0xff] }
  0x2a   : > { %522 = vmatpush.bf16.msra.mxu0 %v932_v17  ;;  %551 = vmatpush.bf16.msra.mxu1 %v936_v18  ;;  %v995_v33 = vld [vmem:[%s1364_s1 + $0x10] sm:$0xff]  ;;  %v413_v35 = vld [vmem:[%s1367_s4 + $0x8] sm:$0xff]  ;;  %v996_v36 = vld [vmem:[%s1364_s1 + $0x18] sm:$0xff]  ;;  %p1068_p1 = pneg %p1067_p0 }
  0x2b   : > { %v414_v34 = vld [vmem:[%s1367_s4 + $0x10] sm:$0xff]  ;;  %v416_v37 = vld [vmem:[%s1369_s6] sm:$0xff]  ;;  %v421_v38 = vld [vmem:[%s1371_s8 + $0x8] sm:$0xff] }
  0x2c   : > { %459 = vperm.xlu0 %1046, %v411_v19   ;;  %449 = vperm.xlu1 %1047, %v409_v20   ;;  %p1073_p5 = pnand %p1072_p4, %p1068_p1 }
  0x2d   : > { %945 = vmatmul.msk.bf16.vlgmr.msra.gmra.mxu0 %vm502_vm0, %v993_v21  ;;  %949 = vmatmul.msk.bf16.vlgmr.msra.gmra.mxu1 %vm502_vm0, %v993_v21 }
  0x30   : > { %439 = vperm.xlu2 %1048, %v407_v30  }
  0x34   : > { %424 = vperm.xlu0 %1046, %v404_v22   ;;  %429 = vperm.xlu1 %1047, %v405_v23  }
  0x38   : > { %609 = vperm.xlu2 %1048, %v414_v34  }
  0x3c   : > { %614 = vperm.xlu0 %1046, %v415_v24   ;;  %599 = vperm.xlu1 %1047, %v412_v25  }
  0x3d   : > { %946 = vmatmul.msk.bf16.gmra.mxu0 %vm502_vm0, %v994_v26  ;;  %950 = vmatmul.msk.bf16.gmra.mxu1 %vm502_vm0, %v994_v26 }
  0x40   : > { %604 = vperm.xlu2 %1048, %v413_v35  }
  0x44   : > { %696 = vperm.xlu0 %1046, %v418_v28   ;;  %701 = vperm.xlu1 %1047, %v419_v29  }
  0x48   : > { %686 = vperm.xlu2 %1048, %v416_v37  }
  0x4c   : > { %691 = vperm.xlu0 %1046, %v417_v31   ;;  %772 = vperm.xlu1 %1047, %v420_v32  }
  0x4d   : > { %947 = vmatmul.msk.bf16.gmra.mxu0 %vm502_vm0, %v995_v33  ;;  %951 = vmatmul.msk.bf16.gmra.mxu1 %vm502_vm0, %v995_v33 }
  0x50   : > { %777 = vperm.xlu2 %1048, %v421_v38  }
  0x5d   : > { %948 = vmatmul.msk.bf16.gmra.mxu0 %vm502_vm0, %v996_v36  ;;  %952 = vmatmul.msk.bf16.gmra.mxu1 %vm502_vm0, %v996_v36 }
  0x82   : > { %v435_v53 = vpop.permute.xlu2 %434 }
  0x8a   : > { %v440_v0 = vpop.permute.xlu2 %439 }
  0x96   : > { %v445_v51 = vpop.permute.xlu1 %444  ;;  %v455_v52 = vpop.permute.xlu0 %454 }
  0x9e   : > { %v450_v56 = vpop.permute.xlu1 %449  ;;  %v460_v57 = vpop.permute.xlu0 %459 }
  0xa6   : > { %v430_v12 = vpop.permute.xlu1 %429  ;;  %v425_v18 = vpop.permute.xlu0 %424 }
  0xaa   : > { %v524_v39 = vpop.f32.mrf.mxu0  ;;  %v553_v40 = vpop.f32.mrf.mxu1 }
  0xab   : > { %v525_v27 = vadd.f32 %v524_v39, %v425_v18  ;;  %v554_v29 = vadd.f32 %v553_v40, %v425_v18  ;;  %v998_v39 = vld [vmem:[%s1366_s3 + $0x8] sm:$0xff] }
  0xad   : > { %v573_v35 = vmax.f32 %v525_v27, 0.0  ;;  %v574_v36 = vmax.f32 %v554_v29, 0.0 }
  0xb2   : > { %v526_v41 = vpop.f32.mrf.mxu0  ;;  %v555_v42 = vpop.f32.mrf.mxu1 }
  0xb3   : > { %v527_v21 = vadd.f32 %v526_v41, %v430_v12  ;;  %v556_v24 = vadd.f32 %v555_v42, %v430_v12  ;;  %v997_v41 = vld [vmem:[%s1366_s3] sm:$0xff] }
  0xb5   : > { %v575_v31 = vmax.f32 %v527_v21, 0.0  ;;  %v576_v33 = vmax.f32 %v556_v24, 0.0 }
  0xb7   : > { %v589_v37 = vpack.c.bf16 %v575_v31, %v573_v35  ;;  %v590_v38 = vpack.c.bf16 %v576_v33, %v574_v36 }
  0xba   : > { %v529_v43 = vpop.f32.mrf.mxu0  ;;  %v558_v44 = vpop.f32.mrf.mxu1 }
  0xbb   : > { %v530_v16 = vadd.f32 %v529_v43, %v435_v53  ;;  %v559_v19 = vadd.f32 %v558_v44, %v435_v53 }
  0xbd   : > { %v577_v28 = vmax.f32 %v530_v16, 0.0  ;;  %v578_v30 = vmax.f32 %v559_v19, 0.0 }
  0xc2   : > { %v531_v45 = vpop.f32.mrf.mxu0  ;;  %v560_v46 = vpop.f32.mrf.mxu1 }
  0xc3   : > { %v532_v9 = vadd.f32 %v531_v45, %v440_v0  ;;  %v561_v13 = vadd.f32 %v560_v46, %v440_v0  ;;  %v610_v45 = vpop.permute.xlu2 %609 }
  0xc5   : > { %v579_v22 = vmax.f32 %v532_v9, 0.0  ;;  %v580_v25 = vmax.f32 %v561_v13, 0.0  ;;  %v999_v9 = vld [vmem:[%s1368_s5] sm:$0xff] }
  0xc7   : > { %v591_v32 = vpack.c.bf16 %v579_v22, %v577_v28  ;;  %v592_v34 = vpack.c.bf16 %v580_v25, %v578_v30 }
  0xca   : > { %v534_v47 = vpop.f32.mrf.mxu0  ;;  %v563_v48 = vpop.f32.mrf.mxu1 }
  0xcb   : > { %v535_v3 = vadd.f32 %v534_v47, %v445_v51  ;;  %v564_v6 = vadd.f32 %v563_v48, %v445_v51  ;;  %v615_v48 = vpop.permute.xlu0 %614 }
  0xcd   : > { %v581_v17 = vmax.f32 %v535_v3, 0.0  ;;  %v582_v20 = vmax.f32 %v564_v6, 0.0 }
  0xd2   : > { %v536_v49 = vpop.f32.mrf.mxu0  ;;  %v565_v50 = vpop.f32.mrf.mxu1 }
  0xd3   : > { %v537_v61 = vadd.f32 %v536_v49, %v450_v56  ;;  %v566_v1 = vadd.f32 %v565_v50, %v450_v56  ;;  %v605_v50 = vpop.permute.xlu2 %604  ;;  %v600_v56 = vpop.permute.xlu1 %599 }
  0xd5   : > { %v583_v10 = vmax.f32 %v537_v61, 0.0  ;;  %v584_v14 = vmax.f32 %v566_v1, 0.0 }
  0xd7   : > { %v593_v23 = vpack.c.bf16 %v583_v10, %v581_v17  ;;  %v594_v26 = vpack.c.bf16 %v584_v14, %v582_v20  ;;  %v1000_v10 = vld [vmem:[%s1368_s5 + $0x8] sm:$0xff] }
  0xda   : > { %v539_v54 = vpop.f32.mrf.mxu0  ;;  %v568_v55 = vpop.f32.mrf.mxu1 }
  0xdb   : > { %v540_v58 = vadd.f32 %v539_v54, %v455_v52  ;;  %v569_v59 = vadd.f32 %v568_v55, %v455_v52  ;;  %v702_v18 = vpop.permute.xlu1 %701 }
  0xdd   : > { %v585_v4 = vmax.f32 %v540_v58, 0.0  ;;  %v586_v7 = vmax.f32 %v569_v59, 0.0 }
  0xe2   : > { %v541_v60 = vpop.f32.mrf.mxu0  ;;  %v570_v63 = vpop.f32.mrf.mxu1 }
  0xe3   : > { %v542_v62 = vadd.f32 %v541_v60, %v460_v57  ;;  %v571_v2 = vadd.f32 %v570_v63, %v460_v57 }
  0xe5   : > { %v587_v5 = vmax.f32 %v542_v62, 0.0  ;;  %v588_v8 = vmax.f32 %v571_v2, 0.0 }
  0xe7   : > { %v595_v11 = vpack.c.bf16 %v587_v5, %v585_v4  ;;  %v596_v15 = vpack.c.bf16 %v588_v8, %v586_v7 }
  0xe9   : > { %638 = vmatpush.bf16.msra.mxu2 %v595_v11  ;;  %657 = vmatpush.bf16.msra.mxu3 %v596_v15  ;;  %v697_v15 = vpop.permute.xlu0 %696 }
  0xed   : > { %639 = vmatpush.bf16.msra.mxu2 %v593_v23  ;;  %658 = vmatpush.bf16.msra.mxu3 %v594_v26  ;;  %v687_v26 = vpop.permute.xlu2 %686 }
  0xf1   : > { %640 = vmatpush.bf16.msra.mxu2 %v591_v32  ;;  %659 = vmatpush.bf16.msra.mxu3 %v592_v34  ;;  %v692_v20 = vpop.permute.xlu0 %691 }
  0xf5   : > { %641 = vmatpush.bf16.msra.mxu2 %v589_v37  ;;  %660 = vmatpush.bf16.msra.mxu3 %v590_v38 }
  0xf8   : > { %961 = vmatmul.msk.bf16.vlgmr.msra.gmra.mxu2 %vm627_vm1, %v997_v41  ;;  %963 = vmatmul.msk.bf16.vlgmr.msra.gmra.mxu3 %vm627_vm1, %v997_v41 }
 0x108   : > { %962 = vmatmul.msk.bf16.gmra.mxu2 %vm627_vm1, %v998_v39  ;;  %964 = vmatmul.msk.bf16.gmra.mxu3 %vm627_vm1, %v998_v39 }
 0x17b   : > { %v643_v40 = vpop.f32.mrf.mxu2  ;;  %v662_v42 = vpop.f32.mrf.mxu3 }
 0x17c   : > { %v644_v59 = vadd.f32 %v643_v40, %v600_v56  ;;  %v663_v62 = vadd.f32 %v662_v42, %v600_v56 }
 0x17e   : > { %v672_v5 = vmax.f32 %v644_v59, 0.0  ;;  %v673_v6 = vmax.f32 %v663_v62, 0.0 }
 0x183   : > { %v645_v43 = vpop.f32.mrf.mxu2  ;;  %v664_v44 = vpop.f32.mrf.mxu3 }
 0x184   : > { %v646_v53 = vadd.f32 %v645_v43, %v605_v50  ;;  %v665_v57 = vadd.f32 %v664_v44, %v605_v50  ;;  %v1001_v43 = vld [vmem:[%s1370_s7] sm:$0xff]  ;;  %v773_v44 = vpop.permute.xlu1 %772 }
 0x186   : > { %v674_v1 = vmax.f32 %v646_v53, 0.0  ;;  %v675_v3 = vmax.f32 %v665_v57, 0.0 }
 0x188   : > { %v680_v7 = vpack.c.bf16 %v674_v1, %v672_v5  ;;  %v681_v8 = vpack.c.bf16 %v675_v3, %v673_v6 }
 0x18b   : > { %v648_v46 = vpop.f32.mrf.mxu2  ;;  %v667_v47 = vpop.f32.mrf.mxu3 }
 0x18c   : > { %v649_v49 = vadd.f32 %v648_v46, %v610_v45  ;;  %v668_v51 = vadd.f32 %v667_v47, %v610_v45 }
 0x18e   : > { %v676_v60 = vmax.f32 %v649_v49, 0.0  ;;  %v677_v63 = vmax.f32 %v668_v51, 0.0  ;;  %v778_v49 = vpop.permute.xlu2 %777 }
 0x193   : > { %v650_v52 = vpop.f32.mrf.mxu2  ;;  %v669_v55 = vpop.f32.mrf.mxu3 }
 0x194   : > { %v651_v54 = vadd.f32 %v650_v52, %v615_v48  ;;  %v670_v58 = vadd.f32 %v669_v55, %v615_v48 }
 0x196   : > { %v678_v61 = vmax.f32 %v651_v54, 0.0  ;;  %v679_v0 = vmax.f32 %v670_v58, 0.0 }
 0x198   : > { %v682_v2 = vpack.c.bf16 %v678_v61, %v676_v60  ;;  %v683_v4 = vpack.c.bf16 %v679_v0, %v677_v63 }
 0x19a   : > { %726 = vmatpush.bf16.msrb.mxu2 %v682_v2  ;;  %745 = vmatpush.bf16.msrb.mxu3 %v683_v4 }
 0x19e   : > { %727 = vmatpush.bf16.msrb.mxu2 %v680_v7  ;;  %746 = vmatpush.bf16.msrb.mxu3 %v681_v8 }
 0x1a1   : > { %973 = vmatmul.msk.bf16.vlgmr.msrb.gmra.mxu2 %vm502_vm0, %v999_v9  ;;  %975 = vmatmul.msk.bf16.vlgmr.msrb.gmra.mxu3 %vm502_vm0, %v999_v9 }
 0x1b1   : > { %974 = vmatmul.msk.bf16.gmra.mxu2 %vm502_vm0, %v1000_v10  ;;  %976 = vmatmul.msk.bf16.gmra.mxu3 %vm502_vm0, %v1000_v10 }
 0x224   : > { %v729_v11 = vpop.f32.mrf.mxu2  ;;  %v748_v12 = vpop.f32.mrf.mxu3 }
 0x225   : > { %v730_v29 = vadd.f32 %v729_v11, %v687_v26  ;;  %v749_v32 = vadd.f32 %v748_v12, %v687_v26 }
 0x227   : > { %v758_v41 = vmax.f32 %v730_v29, 0.0  ;;  %v759_v39 = vmax.f32 %v749_v32, 0.0 }
 0x22c   : > { %v731_v13 = vpop.f32.mrf.mxu2  ;;  %v750_v14 = vpop.f32.mrf.mxu3 }
 0x22d   : > { %v732_v23 = vadd.f32 %v731_v13, %v692_v20  ;;  %v751_v27 = vadd.f32 %v750_v14, %v692_v20 }
 0x22f   : > { %v760_v35 = vmax.f32 %v732_v23, 0.0  ;;  %v761_v37 = vmax.f32 %v751_v27, 0.0 }
 0x231   : > { %v766_v40 = vpack.c.bf16 %v760_v35, %v758_v41  ;;  %v767_v42 = vpack.c.bf16 %v761_v37, %v759_v39 }
 0x234   : > { %v734_v16 = vpop.f32.mrf.mxu2  ;;  %v753_v17 = vpop.f32.mrf.mxu3 }
 0x235   : > { %v735_v19 = vadd.f32 %v734_v16, %v697_v15  ;;  %v754_v21 = vadd.f32 %v753_v17, %v697_v15 }
 0x237   : > { %v762_v30 = vmax.f32 %v735_v19, 0.0  ;;  %v763_v33 = vmax.f32 %v754_v21, 0.0 }
 0x23c   : > { %v736_v22 = vpop.f32.mrf.mxu2  ;;  %v755_v25 = vpop.f32.mrf.mxu3 }
 0x23d   : > { %v737_v24 = vadd.f32 %v736_v22, %v702_v18  ;;  %v756_v28 = vadd.f32 %v755_v25, %v702_v18 }
 0x23f   : > { %v764_v31 = vmax.f32 %v737_v24, 0.0  ;;  %v765_v34 = vmax.f32 %v756_v28, 0.0 }
 0x241   : > { %v768_v36 = vpack.c.bf16 %v764_v31, %v762_v30  ;;  %v769_v38 = vpack.c.bf16 %v765_v34, %v763_v33 }
 0x243   : > { %794 = vmatpush.bf16.msrb.mxu0 %v768_v36  ;;  %808 = vmatpush.bf16.msrb.mxu1 %v769_v38 }
 0x247   : > { %795 = vmatpush.bf16.msrb.mxu0 %v766_v40  ;;  %809 = vmatpush.bf16.msrb.mxu1 %v767_v42 }
 0x24a   : > { %981 = vmatmul.msk.bf16.vlgmr.msrb.gmra.mxu0 %vm502_vm0, %v1001_v43  ;;  %982 = vmatmul.msk.bf16.vlgmr.msrb.gmra.mxu1 %vm502_vm0, %v1001_v43 }
 0x2c7   : > { %v797_v45 = vpop.f32.mrf.mxu0  ;;  %v811_v47 = vpop.f32.mrf.mxu1 }
 0x2c8   : > { %v798_v46 = vadd.f32 %v797_v45, %v773_v44  ;;  %v812_v48 = vadd.f32 %v811_v47, %v773_v44 }
 0x2ca   : > { %816 = vst [vmem:[%s378_s24] sm:$0xff] %v798_v46 }
 0x2cb   : > { %817 = vst [vmem:[%s378_s24 + $0x8] sm:$0xff] %v812_v48 }
 0x2cf   : > { %v799_v50 = vpop.f32.mrf.mxu0  ;;  %v813_v52 = vpop.f32.mrf.mxu1 }
 0x2d0   : > { %v800_v51 = vadd.f32 %v799_v50, %v778_v49  ;;  %v814_v53 = vadd.f32 %v813_v52, %v778_v49 }
 0x2d2   : > { %818 = vst [vmem:[%s378_s24 + $0x10] sm:$0xff] %v800_v51 }
 0x2d3   : > { %819 = vst [vmem:[%s378_s24 + $0x18] sm:$0xff] %v814_v53 }
 0x2d4   : > { %1076 = shalt.err (!%p1073_p5)
}
 0x2d5   : > { %s1114_s28 = smov 256   ;;  %s1115_s24 = smov 512  }
 0x2d6   : > { %s1116_s27 = smov 16  }
 0x2d7   : > { %1003 = dma.vmem_to_hbm [thread:$0]  (%p1205_p6), %s834_s29, 512, %s836_s14, %s821_s13, %s1114_s28, %s1115_s24, %s1116_s27  }
 0x2d8 PF: > { %s850_s21 = sand.u32 1, %s1099_s30   ;;  %p1006_p7 = pnand %p906_p9, %p1209_p8 }
 0x2d9   : > { %s851_s16 = scalar_lea.sflag [#allocation4], %s850_s21 }
 0x2da   : > { %p1007_p10 = pneg %p1006_p7 }
 0x2dc   : > { %1094 = dma.done.wait (%p1007_p10), %s851_s16, 512  }
 0x2dd   : > { %1096 = vsyncadd (%p1007_p10), %s851_s16, 4294966784  ;;  %p19_p11 = scmp.ge.s32.totalorder %s1190_s15, 4   ;;  %s1375_s30 = smov %s1103_s10 }
 0x2de   : > { %s1376_s10 = smov %s1107_s11  ;;  %s1377_s11 = smov %s1203_s18 }
 0x2df   : > { %s1378_s12 = smov %s1190_s15  ;;  %21 = sbr.rel (!%p19_p11) target bundleno = 3 (0x3), region = 134 }
 0x2e4   :  { %857 = vsyncpa [#allocation4], 1 }
 0x2e5   :  { %859 = vsyncpa [#allocation4 + $0x1], 1 }

</bundles_post_ra>
